<compile_context>
chip_gen: v7x
topology: tpu7x:2x2x1
jax: 0.10.0
libtpu: 0.0.40
codegen_flags: <defaults>
</compile_context>

<pallas_src>
import inspect

import jax
import jax.numpy as jnp
from jax.experimental import pallas as pl
from jax.experimental.pallas import tpu as pltpu


def _round_up(x, m):
    return (x + m - 1) // m * m


# Explicit capability check (instead of a broad try/except retry): does this
# jax expose single-buffered constant blocks via BlockSpec pipeline_mode?
_HAS_BUFFERED = hasattr(pl, "Buffered") and (
    "pipeline_mode" in inspect.signature(pl.BlockSpec).parameters
)


def _vmem_capacity_bytes():
    """Physical per-core VMEM; conservative 64 MiB (v7x) if the query fails."""
    try:
        return int(pltpu.get_tpu_info().vmem_capacity_bytes)
    except Exception:  # non-TPU tracing env / older jax without the query
        return 64 * 1024 * 1024


def glu_kernel(x_ref, w12_ref, b12_ref, w3_ref, b3_ref, o_ref):
    """One M row-tile; fused (w1|w2) matmul + SiLU gate + output matmul.

    MXU matmuls: bf16 operands, f32 accumulation. SiLU and the gating product
    are computed in f32 on the VPU/EUP.
    """
    x = x_ref[...]                                             # (tm, Dp) bf16
    d = w3_ref.shape[0]                                        # Dp (static)

    # Fused linear1|linear2: one MXU launch over the concatenated weight.
    y = jnp.dot(x, w12_ref[...], preferred_element_type=jnp.float32)
    y = y + b12_ref[...]                                       # (tm, 2*Dp) f32

    u = y[:, :d]                                               # linear1 half
    v = y[:, d:]                                               # linear2 half
    u = u * jax.nn.sigmoid(u)                                  # SiLU, f32 (EUP)

    h = (u * v).astype(w3_ref.dtype)                           # (tm, Dp) bf16
    o = jnp.dot(h, w3_ref[...], preferred_element_type=jnp.float32)
    o = o + b3_ref[...]
    o_ref[...] = o.astype(o_ref.dtype)


def _glu_call(x2d, w12, b12, w3, b3, out_dtype, *, tile_m, vmem_limit):
    M, Dp = x2d.shape
    Op = w3.shape[1]
    grid = (M // tile_m,)

    if _HAS_BUFFERED:
        # Constant-index weight blocks are never re-DMA'd across grid steps;
        # single-buffer them so they don't pay the default double-buffer cost.
        def const_spec(shape):
            return pl.BlockSpec(shape, lambda i: (0, 0),
                                pipeline_mode=pl.Buffered(1))
    else:
        def const_spec(shape):
            return pl.BlockSpec(shape, lambda i: (0, 0))

    return pl.pallas_call(
        glu_kernel,
        out_shape=jax.ShapeDtypeStruct((M, Op), out_dtype),
        grid_spec=pltpu.PrefetchScalarGridSpec(
            num_scalar_prefetch=0,
            grid=grid,
            in_specs=[
                pl.BlockSpec((tile_m, Dp), lambda i: (i, 0)),  # x tile (2-buf)
                const_spec((Dp, 2 * Dp)),                      # w1|w2 (resident)
                const_spec((1, 2 * Dp)),                       # b1|b2
                const_spec((Dp, Op)),                          # w3 (resident)
                const_spec((1, Op)),                           # b3
            ],
            out_specs=pl.BlockSpec((tile_m, Op), lambda i: (i, 0)),  # 2-buf
        ),
        compiler_params=pltpu.CompilerParams(
            dimension_semantics=("parallel",),  # M shards across TCs (v7x)
            vmem_limit_bytes=vmem_limit,
        ),
    )(x2d, w12, b12, w3, b3)


def prepare_glu_params(params, *, compute_dtype=jnp.bfloat16):
    """Pad dims to multiples of 128, cast weights to bf16 and fuse w1|w2.

    Call ONCE and reuse across forward calls; re-casting / re-padding per call
    is pure wrapper-side HBM traffic.
    """
    w1, b1 = params["w1"], params["b1"]
    w2, b2 = params["w2"], params["b2"]
    w3, b3 = params["w3"], params["b3"]

    D, O = w3.shape
    Dp = _round_up(D, 128)
    Op = _round_up(O, 128)

    def pad2(a, r, c):
        return jnp.pad(a, ((0, r - a.shape[0]), (0, c - a.shape[1])))

    w1p, w2p, w3p = pad2(w1, Dp, Dp), pad2(w2, Dp, Dp), pad2(w3, Dp, Op)
    b1p, b2p, b3p = pad2(b1, 1, Dp), pad2(b2, 1, Dp), pad2(b3, 1, Op)

    # Fused stage-1 weight: one (Dp, 2*Dp) matmul instead of two (Dp, Dp).
    w12 = jnp.concatenate([w1p, w2p], axis=1).astype(compute_dtype)
    b12 = jnp.concatenate([b1p, b2p], axis=1).astype(jnp.float32)

    return {
        "w12": w12,
        "b12": b12,
        "w3": w3p.astype(compute_dtype),
        "b3": b3p.astype(jnp.float32),
        "d_model": D,
        "out_size": O,
        "d_pad": Dp,
        "o_pad": Op,
        "compute_dtype": compute_dtype,
    }


def glu_pallas(x, prepared, *, tile_m=512):
    """x: (batch, seq, d_model). prepared: output of prepare_glu_params."""
    B, S, D = x.shape
    assert D == prepared["d_model"], "d_model mismatch with prepared params"
    Dp, O, Op = prepared["d_pad"], prepared["out_size"], prepared["o_pad"]
    compute_dtype = prepared["compute_dtype"]
    out_dtype = x.dtype  # write kernel output in the input dtype, not f32

    M = B * S

    # --- M row tile: multiple of 16 (bf16 sublane packing); 128-multiples for
    # the MXU; keep >= 2 tiles when M is big enough so both v7x cores work.
    if M >= 128:
        tm = min(tile_m, _round_up(M, 128))
        if M >= 256:
            tm = min(tm, _round_up(pl.cdiv(M, 2), 128))
        tm = _round_up(tm, 128)
    else:
        tm = _round_up(M, 16)

    # --- VMEM budget: resident weights + double-buffered x/out tiles + f32
    # intermediates; shrink tm until it fits the physical capacity.
    capacity = _vmem_capacity_bytes()
    wbuf = 1 if _HAS_BUFFERED else 2
    witem = jnp.dtype(compute_dtype).itemsize
    oitem = jnp.dtype(out_dtype).itemsize

    def vmem_need(t):
        return (wbuf * (Dp * 2 * Dp + Dp * Op) * witem       # w12, w3
                + wbuf * (2 * Dp + Op) * 4                    # b12, b3 (f32)
                + 2 * t * Dp * witem                          # x tile (2-buf)
                + 2 * t * Op * oitem                          # out tile (2-buf)
                + t * (3 * Dp + Op) * 4)                      # y, h, o interm.

    while tm > 128 and 2 * vmem_need(tm) > capacity:
        tm = _round_up(tm // 2, 128)
    vmem_limit = int(min(capacity, max(2 * vmem_need(tm), 32 * 1024 * 1024)))

    M_pad = _round_up(M, tm)

    # --- activations -------------------------------------------------------
    x2d = x.reshape(M, D)
    if x2d.dtype != compute_dtype:
        # TODO(synk): accept bf16 activations (or allow_input_fusion) to avoid
        # this wrapper-side cast round trip through HBM.
        x2d = x2d.astype(compute_dtype)
    if M_pad != M or Dp != D:
        x2d = jnp.pad(x2d, ((0, M_pad - M), (0, Dp - D)))

    out2d = _glu_call(x2d, prepared["w12"], prepared["b12"],
                      prepared["w3"], prepared["b3"], out_dtype,
                      tile_m=tm, vmem_limit=vmem_limit)

    return out2d[:M, :O].reshape(B, S, O)


def init_glu_params(key, d_model, out_size, dtype=jnp.float32):
    """Deterministic init mirroring nn.Linear shapes (weights stored as W^T)."""
    k1, k2, k3, k4, k5, k6 = jax.random.split(key, 6)
    bound = 1.0 / (d_model ** 0.5)
    return {
        "w1": jax.random.uniform(k1, (d_model, d_model), dtype, -bound, bound),
        "b1": jax.random.uniform(k2, (1, d_model), dtype, -bound, bound),
        "w2": jax.random.uniform(k3, (d_model, d_model), dtype, -bound, bound),
        "b2": jax.random.uniform(k4, (1, d_model), dtype, -bound, bound),
        "w3": jax.random.uniform(k5, (d_model, out_size), dtype, -bound, bound),
        "b3": jax.random.uniform(k6, (1, out_size), dtype, -bound, bound),
    }


def glu_reference(x, p):
    """Pure-JAX f32 reference for correctness check."""
    u = x @ p["w1"] + p["b1"][0]
    u = u * jax.nn.sigmoid(u)
    v = x @ p["w2"] + p["b2"][0]
    return (u * v) @ p["w3"] + p["b3"][0]


if __name__ == "__main__":
    d_model, out_size = 32, 16
    batch, seq = 2, 8

    key = jax.random.PRNGKey(0)
    kx, kp = jax.random.split(key)
    x = jax.random.normal(kx, (batch, seq, d_model), jnp.float32)
    params = init_glu_params(kp, d_model, out_size)

    prepared = prepare_glu_params(params)          # pad/cast/fuse ONCE
    out = glu_pallas(x, prepared)
    out = jax.block_until_ready(out)

    ref = glu_reference(x, params)
    assert out.shape == (batch, seq, out_size)
    assert out.dtype == x.dtype
    # bf16 MXU operands (f32 accumulation) => relaxed tolerance vs f32 ref.
    assert jnp.allclose(out, ref, atol=2e-2, rtol=2e-2), "mismatch vs reference"

    print("KERNEL_OK")
</pallas_src>

<mosaic_0001>
module attributes {stable_mosaic.version = 11 : i64} {
  func.func @glu_kernel(%arg0: i32, %arg1: memref<16x128xbf16, #tpu.memory_space<vmem>>, %arg2: memref<128x256xbf16, #tpu.memory_space<vmem>>, %arg3: memref<1x256xf32, #tpu.memory_space<vmem>>, %arg4: memref<128x128xbf16, #tpu.memory_space<vmem>>, %arg5: memref<1x128xf32, #tpu.memory_space<vmem>>, %arg6: memref<16x128xf32, #tpu.memory_space<vmem>>) attributes {dimension_semantics = [#tpu.dimension_semantics<parallel>], iteration_bounds = array<i64: 1>, scalar_prefetch = 0 : i64, scratch_operands = 0 : i64, tpu.core_type = #tpu.core_type<tc>, window_params = [{transform_indices = @transform_0, window_bounds = array<i64: 16, 128>}, {pipeline_mode = #tpu.pipeline_mode<synchronous>, transform_indices = @transform_1, window_bounds = array<i64: 128, 256>}, {pipeline_mode = #tpu.pipeline_mode<synchronous>, transform_indices = @transform_2, window_bounds = array<i64: 1, 256>}, {pipeline_mode = #tpu.pipeline_mode<synchronous>, transform_indices = @transform_3, window_bounds = array<i64: 128, 128>}, {pipeline_mode = #tpu.pipeline_mode<synchronous>, transform_indices = @transform_4, window_bounds = array<i64: 1, 128>}, {transform_indices = @transform_5, window_bounds = array<i64: 16, 128>}]} {
    %c0 = arith.constant 0 : index
    %c0_0 = arith.constant 0 : index
    %0 = vector.load %arg1[%c0, %c0_0] : memref<16x128xbf16, #tpu.memory_space<vmem>>, vector<16x128xbf16>
    %c0_1 = arith.constant 0 : index
    %c0_2 = arith.constant 0 : index
    %1 = vector.load %arg2[%c0_1, %c0_2] : memref<128x256xbf16, #tpu.memory_space<vmem>>, vector<128x256xbf16>
    %cst = arith.constant dense<0.000000e+00> : vector<16x256xf32>
    %2 = tpu.matmul %0, %1, %cst {dimension_numbers = #tpu.dot_dimension_numbers<[1], [0], [0], [1], [0, 0, 1, 1], [], []>} : vector<16x128xbf16>, vector<128x256xbf16>, vector<16x256xf32> -> vector<16x256xf32>
    %c0_3 = arith.constant 0 : index
    %c0_4 = arith.constant 0 : index
    %3 = vector.load %arg3[%c0_3, %c0_4] : memref<1x256xf32, #tpu.memory_space<vmem>>, vector<1x256xf32>
    %4 = vector.broadcast %3 : vector<1x256xf32> to vector<16x256xf32>
    %5 = arith.addf %2, %4 : vector<16x256xf32>
    %6 = vector.extract_strided_slice %5 {offsets = [0, 0], sizes = [16, 128], strides = [1, 1]} : vector<16x256xf32> to vector<16x128xf32>
    %7 = vector.extract_strided_slice %5 {offsets = [0, 128], sizes = [16, 128], strides = [1, 1]} : vector<16x256xf32> to vector<16x128xf32>
    %8 = arith.negf %6 : vector<16x128xf32>
    %9 = math.exp %8 : vector<16x128xf32>
    %cst_5 = arith.constant 1.000000e+00 : f32
    %10 = vector.broadcast %cst_5 : f32 to vector<16x128xf32>
    %11 = arith.addf %10, %9 : vector<16x128xf32>
    %12 = arith.divf %10, %11 : vector<16x128xf32>
    %13 = arith.mulf %6, %12 : vector<16x128xf32>
    %14 = arith.mulf %13, %7 : vector<16x128xf32>
    %15 = arith.truncf %14 : vector<16x128xf32> to vector<16x128xbf16>
    %c0_6 = arith.constant 0 : index
    %c0_7 = arith.constant 0 : index
    %16 = vector.load %arg4[%c0_6, %c0_7] : memref<128x128xbf16, #tpu.memory_space<vmem>>, vector<128x128xbf16>
    %cst_8 = arith.constant dense<0.000000e+00> : vector<16x128xf32>
    %17 = tpu.matmul %15, %16, %cst_8 {dimension_numbers = #tpu.dot_dimension_numbers<[1], [0], [0], [1], [0, 0, 1, 1], [], []>} : vector<16x128xbf16>, vector<128x128xbf16>, vector<16x128xf32> -> vector<16x128xf32>
    %c0_9 = arith.constant 0 : index
    %c0_10 = arith.constant 0 : index
    %18 = vector.load %arg5[%c0_9, %c0_10] : memref<1x128xf32, #tpu.memory_space<vmem>>, vector<1x128xf32>
    %19 = vector.broadcast %18 : vector<1x128xf32> to vector<16x128xf32>
    %20 = arith.addf %17, %19 : vector<16x128xf32>
    %c0_11 = arith.constant 0 : index
    %c0_12 = arith.constant 0 : index
    %21 = vector.load %arg6[%c0_11, %c0_12] : memref<16x128xf32, #tpu.memory_space<vmem>>, vector<16x128xf32>
    tpu.vector_store %arg6[%c0_11, %c0_12], %20 {strides = array<i32>} : memref<16x128xf32, #tpu.memory_space<vmem>>, vector<16x128xf32>,
    return
  }
  func.func @transform_0(%arg0: i32) -> (i32, i32) {
    %c0_i32 = arith.constant 0 : i32
    %c0_i32_0 = arith.constant 0 : i32
    return %arg0, %c0_i32 : i32, i32
  }
  func.func @transform_1(%arg0: i32) -> (i32, i32) {
    %c0_i32 = arith.constant 0 : i32
    %c0_i32_0 = arith.constant 0 : i32
    %c0_i32_1 = arith.constant 0 : i32
    return %c0_i32, %c0_i32_0 : i32, i32
  }
  func.func @transform_2(%arg0: i32) -> (i32, i32) {
    %c0_i32 = arith.constant 0 : i32
    %c0_i32_0 = arith.constant 0 : i32
    %c0_i32_1 = arith.constant 0 : i32
    return %c0_i32, %c0_i32_0 : i32, i32
  }
  func.func @transform_3(%arg0: i32) -> (i32, i32) {
    %c0_i32 = arith.constant 0 : i32
    %c0_i32_0 = arith.constant 0 : i32
    %c0_i32_1 = arith.constant 0 : i32
    return %c0_i32, %c0_i32_0 : i32, i32
  }
  func.func @transform_4(%arg0: i32) -> (i32, i32) {
    %c0_i32 = arith.constant 0 : i32
    %c0_i32_0 = arith.constant 0 : i32
    %c0_i32_1 = arith.constant 0 : i32
    return %c0_i32, %c0_i32_0 : i32, i32
  }
  func.func @transform_5(%arg0: i32) -> (i32, i32) {
    %c0_i32 = arith.constant 0 : i32
    %c0_i32_0 = arith.constant 0 : i32
    return %arg0, %c0_i32 : i32, i32
  }
}

</mosaic_0001>

<bundles_post_ra>
// kernel: tpu_custom_call.1
= control target key start
LH: loop header
LB: loop body
LE: loop exit
PB: predicated region body
PF: predicated region fallthrough
CT: control target
= control target key end

     0   :  { %10 = vsyncpa [#allocation3], 0  ;;  %s675_s0 = inlined_call_operand.hbm [shape: bf16[16,128], index: 0, kind: input, shape index: {}]   ;;  %s676_s1 = inlined_call_operand.hbm [shape: bf16[128,256], index: 1, kind: input, shape index: {}]   ;;  %s677_s2 = inlined_call_operand.vmem [shape: f32[1,256], index: 2, kind: input, shape index: {}]   ;;  %s678_s3 = inlined_call_operand.hbm [shape: bf16[128,128], index: 3, kind: input, shape index: {}]   ;;  %s679_s4 = inlined_call_operand.vmem [shape: f32[1,128], index: 4, kind: input, shape index: {}]   ;;  %s680_s5 = inlined_call_operand.hbm [shape: f32[16,128], index: 5, kind: output, shape index: {}]  }
   0x1   :  { %11 = vsyncpa [#allocation6], 0 }
   0x2   :  { %12 = vsyncpa [#allocation4], 0  ;;  %s574_s18 = smov [#allocation5]   ;;  %s480_s22 = scalar_lea.hbm %s676_s1, 2048 }
   0x3   :  { %s30_s19 = sshll.u32 %s574_s18, 4  ;;  %p481_p0 = scmp.ne.s32.totalorder %s676_s1, %s480_s22  ;;  %s31_s19 = int_to_ptr.vmem [resolvable:$true] %s30_s19 }
   0x4   :  { %p484_p1 = scmp.lt.u32.totalorder %s480_s22, %s676_s1 }
   0x6   :  { %p486_p2 = pnand %p484_p1, %p481_p0 }
   0x8   :  { %489 = shalt.err (!%p486_p2)
}
   0x9   :  { %s490_s27 = scalar_lea.vmem %s31_s19, 2048  ;;  %p495_p4 = scmp.lt.s32.totalorder %s31_s19, %s31_s19 }
   0xa   :  { %p491_p3 = scmp.ne.s32.totalorder %s31_s19, %s490_s27  ;;  %p496_p5 = scmp.lt.s32.totalorder %s490_s27, %s490_s27 }
   0xc   :  { %p497_p6 = por %p496_p5, %p495_p4 }
   0xe   :  { %p498_p7 = pnand %p497_p6, %p491_p3 }
  0x10   :  { %501 = shalt.err (!%p498_p7)
}
  0x11   :  { %s575_s28 = smov 128   ;;  %s576_s29 = smov 8  }
  0x12   :  { %36 = dma.hbm_to_vmem [thread:$0]  %s676_s1, 2048, %s31_s19, [#allocation6], %s575_s28, %s575_s28, %s576_s29  }
  0x13   :  { %s577_s7 = smov [#allocation2]   ;;  %s502_s11 = scalar_lea.hbm %s675_s0, 128 }
  0x14   :  { %s18_s8 = sshll.u32 %s577_s7, 4  ;;  %p503_p8 = scmp.ne.s32.totalorder %s675_s0, %s502_s11  ;;  %s19_s8 = int_to_ptr.vmem [resolvable:$true] %s18_s8 }
  0x15   :  { %p506_p9 = scmp.lt.u32.totalorder %s502_s11, %s675_s0 }
  0x17   :  { %p508_p10 = pnand %p506_p9, %p503_p8 }
  0x19   :  { %511 = shalt.err (!%p508_p10)
}
  0x1a   :  { %s512_s16 = scalar_lea.vmem %s19_s8, 128  ;;  %p517_p12 = scmp.lt.s32.totalorder %s19_s8, %s19_s8 }
  0x1b   :  { %p513_p11 = scmp.ne.s32.totalorder %s19_s8, %s512_s16  ;;  %p518_p13 = scmp.lt.s32.totalorder %s512_s16, %s512_s16 }
  0x1d   :  { %p519_p0 = por %p518_p13, %p517_p12 }
  0x1f   :  { %p520_p1 = pnand %p519_p0, %p513_p11 }
  0x21   :  { %523 = shalt.err (!%p520_p1)
}
  0x22   :  { %s578_s1 = smov 64   ;;  %s579_s17 = smov 4  }
  0x23   :  { %24 = dma.hbm_to_vmem [thread:$0]  %s675_s0, 128, %s19_s8, [#allocation3], %s578_s1, %s578_s1, %s579_s17  }
  0x24   :  { %s580_s20 = smov [#allocation7]   ;;  %s524_s24 = scalar_lea.hbm %s678_s3, 1024 }
  0x25   :  { %s44_s21 = sshll.u32 %s580_s20, 4  ;;  %p525_p2 = scmp.ne.s32.totalorder %s678_s3, %s524_s24  ;;  %s45_s21 = int_to_ptr.vmem [resolvable:$true] %s44_s21 }
  0x26   :  { %p528_p3 = scmp.lt.u32.totalorder %s524_s24, %s678_s3 }
  0x28   :  { %p530_p4 = pnand %p528_p3, %p525_p2 }
  0x2a   :  { %533 = shalt.err (!%p530_p4)
}
  0x2b   :  { %s534_s6 = scalar_lea.vmem %s45_s21, 1024  ;;  %p539_p6 = scmp.lt.s32.totalorder %s45_s21, %s45_s21 }
  0x2c   :  { %p535_p5 = scmp.ne.s32.totalorder %s45_s21, %s534_s6  ;;  %p540_p7 = scmp.lt.s32.totalorder %s534_s6, %s534_s6 }
  0x2e   :  { %p541_p8 = por %p540_p7, %p539_p6 }
  0x30   :  { %p542_p9 = pnand %p541_p8, %p535_p5 }
  0x32   :  { %545 = shalt.err (!%p542_p9)
}
  0x33   :  { %50 = dma.hbm_to_vmem [thread:$0]  %s678_s3, 1024, %s45_s21, [#allocation6], %s578_s1, %s578_s1, %s579_s17  }
  0x34   :  { %568 = dma.done.wait [#allocation3], 128  }
  0x35   :  { %569 = vsyncadd [#allocation3], 4294967168 }
  0x36   :  { %570 = dma.done.wait [#allocation6], 3072  }
  0x37   :  { %571 = vsyncadd [#allocation6], 4294964224  ;;  %v581_v0 = vmov 0   ;;  %v439_v1 = vld [vmem:[#allocation5 + $0x4] ss:$8 sps:$4 sm:$0xff]   ;;  %v463_v17 = vld [vmem:[#allocation2] sm:$0xff]   ;;  %v83_v27 = vlaneseq }
  0x38   :  { %211 = vmatprep.mubr.bf16.mxu0 %v581_v0  ;;  %v441_v2 = vld [vmem:[#allocation5] ss:$8 sps:$4 sm:$0xff]   ;;  %179 = vmatprep.subr.bf16.mxu0 %v439_v1  ;;  %v442_v3 = vld [vmem:[#allocation5 + $0x14] ss:$8 sps:$4 sm:$0xff]   ;;  %v444_v4 = vld [vmem:[#allocation5 + $0x10] ss:$8 sps:$4 sm:$0xff]  }
  0x39   :  { %180 = vmatpush1.bf16.msra.mxu0 %v441_v2  ;;  %v445_v5 = vld [vmem:[#allocation5 + $0x24] ss:$8 sps:$4 sm:$0xff]   ;;  %v447_v6 = vld [vmem:[#allocation5 + $0x20] ss:$8 sps:$4 sm:$0xff]   ;;  %v448_v7 = vld [vmem:[#allocation5 + $0x34] ss:$8 sps:$4 sm:$0xff]  }
  0x3a   :  { %181 = vmatprep.subr.bf16.mxu0 %v442_v3  ;;  %v450_v8 = vld [vmem:[#allocation5 + $0x30] ss:$8 sps:$4 sm:$0xff]   ;;  %v451_v9 = vld [vmem:[#allocation5 + $0x44] ss:$8 sps:$4 sm:$0xff]   ;;  %v453_v10 = vld [vmem:[#allocation5 + $0x40] ss:$8 sps:$4 sm:$0xff]  }
  0x3b   :  { %v454_v11 = vld [vmem:[#allocation5 + $0x54] ss:$8 sps:$4 sm:$0xff]   ;;  %v456_v12 = vld [vmem:[#allocation5 + $0x50] ss:$8 sps:$4 sm:$0xff]   ;;  %v457_v13 = vld [vmem:[#allocation5 + $0x64] ss:$8 sps:$4 sm:$0xff]  }
  0x3c   :  { %v459_v14 = vld [vmem:[#allocation5 + $0x60] ss:$8 sps:$4 sm:$0xff]   ;;  %v460_v15 = vld [vmem:[#allocation5 + $0x74] ss:$8 sps:$4 sm:$0xff]   ;;  %v462_v16 = vld [vmem:[#allocation5 + $0x70] ss:$8 sps:$4 sm:$0xff]  }
  0x3d   :  { %182 = vmatpush1.bf16.msra.mxu0 %v444_v4  ;;  %v464_v18 = vld [vmem:[#allocation7] sm:$0xff]   ;;  %v582_v19 = vmov 0.0   ;;  %v465_v20 = vld [vmem:[#allocation7 + $0x8] sm:$0xff]   ;;  %v466_v21 = vld [vmem:[#allocation7 + $0x10] sm:$0xff]   ;;  %vm583_vm0 = vmmov 0   ;;  %v84_v28 = vshrl.u32 %v83_v27, 7 }
  0x3e   :  { %183 = vmatprep.subr.bf16.mxu0 %v445_v5  ;;  %408 = vmatprep.subr.bf16.mxu1 %v582_v19  ;;  %v467_v22 = vld [vmem:[#allocation7 + $0x18] sm:$0xff]   ;;  %v468_v23 = vld [vmem:[#allocation7 + $0x20] sm:$0xff]   ;;  %v469_v24 = vld [vmem:[#allocation7 + $0x28] sm:$0xff]   ;;  %s584_s10 = smov [#allocation8]  }
  0x3f   :  { %409 = vmatpush3.bf16.msra.mxu1 %v464_v18  ;;  %v470_v25 = vld [vmem:[#allocation7 + $0x30] sm:$0xff]   ;;  %v471_v26 = vld [vmem:[#allocation7 + $0x38] sm:$0xff]   ;;  %424 = vmatprep.mubr.msk.bf16.mxu1 %vm583_vm0, %v582_v19  ;;  %v85_v29 = vsub.s32 0, %v84_v28  ;;  %v89_v44 = vsub.s32 1, %v84_v28  ;;  %s358_s11 = sshll.u32 %s584_s10, 4  ;;  %s359_s11 = int_to_ptr.vmem [resolvable:$true] %s358_s11 }
  0x40   :  { %410 = vmatprep.subr.bf16.mxu1 %v582_v19  ;;  %v81_v30 = vld [vmem:[%s677_s2] sm:$0x3]  ;;  %s546_s12 = scalar_lea.vmem %s359_s11, 256  ;;  %p551_p11 = scmp.lt.s32.totalorder %s359_s11, %s359_s11 }
  0x41   :  { %184 = vmatpush1.bf16.msra.mxu0 %v447_v6  ;;  %v86_v31 = vrot.slane %v81_v30, %v85_v29  ;;  %v90_v45 = vrot.slane %v81_v30, %v89_v44  ;;  %v390_v55 = vld [vmem:[%s679_s4] ss:$0 sm:$0xff]  ;;  %p547_p10 = scmp.ne.s32.totalorder %s359_s11, %s546_s12  ;;  %p552_p12 = scmp.lt.s32.totalorder %s546_s12, %s546_s12 }
  0x42   :  { %185 = vmatprep.subr.bf16.mxu0 %v448_v7 }
  0x43   :  { %411 = vmatpush3.bf16.msra.mxu1 %v465_v20  ;;  %p553_p13 = por %p552_p12, %p551_p11 }
  0x44   :  { %412 = vmatprep.subr.bf16.mxu1 %v582_v19 }
  0x45   :  { %186 = vmatpush1.bf16.msra.mxu0 %v450_v8  ;;  %p554_p0 = pnand %p553_p13, %p547_p10 }
  0x46   :  { %187 = vmatprep.subr.bf16.mxu0 %v451_v9 }
  0x47   :  { %413 = vmatpush3.bf16.msra.mxu1 %v466_v21 }
  0x48   :  { %414 = vmatprep.subr.bf16.mxu1 %v582_v19 }
  0x49   :  { %188 = vmatpush1.bf16.msra.mxu0 %v453_v10 }
  0x4a   :  { %189 = vmatprep.subr.bf16.mxu0 %v454_v11 }
  0x4b   :  { %415 = vmatpush3.bf16.msra.mxu1 %v467_v22 }
  0x4c   :  { %416 = vmatprep.subr.bf16.mxu1 %v582_v19 }
  0x4d   :  { %190 = vmatpush1.bf16.msra.mxu0 %v456_v12 }
  0x4e   :  { %191 = vmatprep.subr.bf16.mxu0 %v457_v13 }
  0x4f   :  { %417 = vmatpush3.bf16.msra.mxu1 %v468_v23 }
  0x50   :  { %418 = vmatprep.subr.bf16.mxu1 %v582_v19 }
  0x51   :  { %192 = vmatpush1.bf16.msra.mxu0 %v459_v14 }
  0x52   :  { %193 = vmatprep.subr.bf16.mxu0 %v460_v15 }
  0x53   :  { %419 = vmatpush3.bf16.msra.mxu1 %v469_v24 }
  0x54   :  { %420 = vmatprep.subr.bf16.mxu1 %v582_v19 }
  0x55   :  { %194 = vmatpush1.bf16.msra.mxu0 %v462_v16 }
  0x57   :  { %421 = vmatpush3.bf16.msra.mxu1 %v470_v25 }
  0x58   :  { %212 = vmatmul.mubr.bf16.vlgmr.msra.gmra.mrb[0].mxu0 %v463_v17  ;;  %422 = vmatprep.subr.bf16.mxu1 %v582_v19 }
  0x5b   :  { %423 = vmatpush3.bf16.msra.mxu1 %v471_v26 }
 0x12b   :  { %v213_v32 = vpop.f32.mrb[0].mxu0 }
 0x12c   :  { %v214_v33 = vadd.f32 %v213_v32, %v86_v31  ;;  %v215_v34 = vpop.f32.mrb[1].mxu0 }
 0x12d   :  { %v217_v35 = vpop.f32.mrb[2].mxu0  ;;  %v216_v48 = vadd.f32 %v215_v34, %v90_v45 }
 0x12e   :  { %v388_v36 = vmul.f32 -1.442695, %v214_v33  ;;  %v218_v37 = vadd.f32 %v217_v35, %v86_v31  ;;  %v219_v38 = vpop.f32.mrb[3].mxu0 }
 0x12f   :  { %v220_v52 = vadd.f32 %v219_v38, %v90_v45 }
 0x130   :  { %472 = vpow2.f32 %v388_v36  ;;  %v389_v39 = vmul.f32 -1.442695, %v218_v37 }
 0x132   :  { %474 = vpow2.f32 %v389_v39 }
 0x13a   :  { %v473_v40 = vpop.eup %472 }
 0x13b   :  { %v228_v41 = vadd.f32 1.0, %v473_v40 }
 0x13c   :  { %v475_v42 = vpop.eup %474 }
 0x13d   :  { %476 = vrcp.f32 %v228_v41  ;;  %v229_v43 = vadd.f32 1.0, %v475_v42 }
 0x13f   :  { %478 = vrcp.f32 %v229_v43 }
 0x147   :  { %v477_v46 = vpop.eup %476 }
 0x148   :  { %v234_v47 = vmul.f32 %v477_v46, %v214_v33 }
 0x149   :  { %v479_v49 = vpop.eup %478 }
 0x14a   :  { %v236_v50 = vmul.f32 %v234_v47, %v216_v48  ;;  %v235_v51 = vmul.f32 %v479_v49, %v218_v37 }
 0x14c   :  { %v237_v53 = vmul.f32 %v235_v51, %v220_v52 }
 0x14e   :  { %v238_v54 = vpack.c.bf16 %v237_v53, %v236_v50 }
 0x150   :  { %425 = vmatmul.mubr.bf16.vlgmr.msra.gmra.mrb[0].mxu1 %v238_v54 }
 0x223   :  { %v344_v56 = vpop.f32.mrb[0].mxu1 }
 0x224   :  { %v345_v57 = vadd.f32 %v390_v55, %v344_v56  ;;  %v426_v58 = vpop.f32.mrb[1].mxu1 }
 0x225   :  { %v347_v59 = vpop.f32.mrb[2].mxu1 }
 0x226   :  { %351 = vst [vmem:[#allocation8] sm:$0xff] %v345_v57  ;;  %v348_v60 = vadd.f32 %v390_v55, %v347_v59  ;;  %v427_v61 = vpop.f32.mrb[3].mxu1 }
 0x228   :  { %352 = vst [vmem:[#allocation8 + $0x8] sm:$0xff] %v348_v60 }
 0x229   :  { %557 = shalt.err (!%p554_p0)
}
 0x22a   :  { %s558_s14 = scalar_lea.hbm %s680_s5, 256 }
 0x22b   :  { %p559_p1 = scmp.ne.s32.totalorder %s680_s5, %s558_s14  ;;  %p562_p2 = scmp.lt.u32.totalorder %s558_s14, %s680_s5 }
 0x22d   :  { %p564_p3 = pnand %p562_p2, %p559_p1 }
 0x22f   :  { %567 = shalt.err (!%p564_p3)
}
 0x230   :  { %364 = dma.vmem_to_hbm [thread:$0]  %s359_s11, 256, %s680_s5, [#allocation4], %s575_s28, %s575_s28, %s576_s29  }
 0x231   :  { %572 = dma.done.wait [#allocation4], 256  }
 0x232   :  { %573 = vsyncadd [#allocation4], 4294967040 }
 0x233   :  { %368 = vsyncpa [#allocation3], 1 }
 0x234   :  { %369 = vsyncpa [#allocation6], 1 }
 0x235   :  { %370 = vsyncpa [#allocation4], 1 }

</bundles_post_ra>
